<compile_context>
chip_gen: v7x
topology: tpu7x:2x2x1
jax: 0.10.0
libtpu: 0.0.40
codegen_flags: <defaults>
</compile_context>

<pallas_src>
from functools import partial
import math

import jax
import jax.numpy as jnp
from jax.experimental import pallas as pl
from jax.experimental.pallas import tpu as pltpu


def _boosted_linear_kernel(x_ref, w_ref, b_ref, o_ref, *, omega):
    # x_ref: (tm, in)  w_ref: (in, tn)  b_ref: (1, tn)  o_ref: (tm, tn)
    xs = x_ref[...] * omega                                              # VPU (free under MXU)
    acc = jnp.dot(xs, w_ref[...], preferred_element_type=jnp.float32)   # MXU, f32 accumulate
    o_ref[...] = (acc + b_ref[...]).astype(o_ref.dtype)


def _round_up(x, m):
    return (x + m - 1) // m * m


def prepare_boosted_linear_params(weight, bias=None):
    """One-time parameter prep (do NOT call per forward).

    weight: (out_features, in_features)  -- PyTorch nn.Linear layout
    bias:   (out_features,) or None (bias=False)
    Returns (w_t, b2d, out_features):
      w_t: (in_features, out_padded)  pre-transposed, out padded to 128 lanes
      b2d: (1, out_padded)
    """
    out_features, in_features = weight.shape
    out_padded = _round_up(out_features, 128)
    w_t = weight.T                                  # (in, out): lane-dense output
    b = jnp.zeros((out_features,), weight.dtype) if bias is None else bias
    if out_padded != out_features:
        w_t = jnp.pad(w_t, ((0, 0), (0, out_padded - out_features)))
        b = jnp.pad(b, (0, out_padded - out_features))
    return w_t, b.reshape(1, out_padded), out_features


def _choose_tn(in_features, out_padded, max_weight_tile_bytes=8 * 1024 * 1024):
    # Keep each (in, tn) f32 weight tile under ~8 MiB so the kernel fits the
    # scoped-VMEM budget on every generation (v7x: 64 MiB physical).
    if in_features * out_padded * 4 <= max_weight_tile_bytes:
        return out_padded
    tn = (max_weight_tile_bytes // (in_features * 4)) // 128 * 128
    return int(max(128, min(tn, out_padded)))


@partial(jax.jit, static_argnames=("omega", "out_features", "tm"))
def boosted_linear_forward(x, w_t, b2d, *, omega, out_features, tm=256):
    """BoostedLinear.forward: (x * omega) @ W.T + b.

    x:   (..., in_features)
    w_t: (in_features, out_padded)   -- from prepare_boosted_linear_params
    b2d: (1, out_padded)
    """
    in_features, out_padded = w_t.shape
    orig_shape = x.shape
    x2d = x.reshape(-1, in_features)
    m = x2d.shape[0]

    # Row tile: large (multiple of 256 -> MXU/sublane aligned) for throughput;
    # shrink only when the whole problem is smaller than one tile (a block that
    # equals the full array dim is always legal, even if not (8,128)-aligned).
    tm_eff = m if m <= tm else tm
    tn = _choose_tn(in_features, out_padded)

    # Rows outer, out-cols inner: the x tile's block index is constant across
    # the inner loop, so the (large) activation tile is DMA'd exactly once.
    grid = (pl.cdiv(m, tm_eff), pl.cdiv(out_padded, tn))

    # Scoped-VMEM budget: double-buffered x / weight / bias / out tiles, with
    # 2x headroom (v5e default scoped limit is only 16 MiB), clamped to the
    # v7x physical capacity of 64 MiB.
    bytes_per = 4
    est = 2 * bytes_per * (
        tm_eff * in_features + tm_eff * tn + in_features * tn + tn)
    vmem_limit = int(min(max(2 * est, 16 * 1024 * 1024), 64 * 1024 * 1024))

    out = pl.pallas_call(
        partial(_boosted_linear_kernel, omega=float(omega)),
        out_shape=jax.ShapeDtypeStruct((m, out_padded), x.dtype),
        grid_spec=pltpu.PrefetchScalarGridSpec(
            num_scalar_prefetch=0,
            grid=grid,
            in_specs=[
                pl.BlockSpec((tm_eff, in_features), lambda i, j: (i, 0)),
                pl.BlockSpec((in_features, tn), lambda i, j: (0, j)),
                pl.BlockSpec((1, tn), lambda i, j: (0, j)),
            ],
            out_specs=pl.BlockSpec((tm_eff, tn), lambda i, j: (i, j)),
        ),
        compiler_params=pltpu.CompilerParams(
            dimension_semantics=("parallel", "parallel"),
            vmem_limit_bytes=vmem_limit,
        ),
    )(x2d, w_t, b2d)

    if out_padded != out_features:
        out = out[:, :out_features]
    return out.reshape(*orig_shape[:-1], out_features)


def init_boosted_linear_params(key, in_dim, out_dim, *, bias=True):
    """nn.Linear default init: kaiming_uniform(a=sqrt(5)) -> U(-1/sqrt(in), 1/sqrt(in))."""
    k_w, k_b = jax.random.split(key)
    bound = 1.0 / math.sqrt(in_dim)
    weight = jax.random.uniform(k_w, (out_dim, in_dim), jnp.float32, -bound, bound)
    b = (jax.random.uniform(k_b, (out_dim,), jnp.float32, -bound, bound)
         if bias else None)
    return weight, b


if __name__ == "__main__":
    key = jax.random.PRNGKey(0)
    k_in, k_params = jax.random.split(key)

    # Small shapes consistent with a NeRF MLP layer: batch=2, seq=8, 32 -> 32.
    batch, seq = 2, 8
    in_dim, out_dim = 32, 32
    omega = 30.0

    x = jax.random.normal(k_in, (batch, seq, in_dim), jnp.float32)
    weight, bias = init_boosted_linear_params(k_params, in_dim, out_dim, bias=True)

    # One-time prep (transpose + lane padding) -- hoisted out of the forward path.
    w_t, b2d, out_features = prepare_boosted_linear_params(weight, bias)

    y = boosted_linear_forward(x, w_t, b2d, omega=omega, out_features=out_features)
    y = jax.block_until_ready(y)

    # Reference: BoostedLinear.forward(x) = (x * omega) @ W.T + b
    y_ref = (x * omega) @ weight.T + bias
    assert y.shape == (batch, seq, out_dim)
    assert jnp.allclose(y, y_ref, atol=1e-3, rtol=1e-3), float(
        jnp.max(jnp.abs(y - y_ref)))

    # bias=False path (nn.Linear(bias=False)) also exercised once.
    w2, _ = init_boosted_linear_params(k_params, in_dim, out_dim, bias=False)
    w2_t, b2_2d, out2 = prepare_boosted_linear_params(w2, None)
    y2 = jax.block_until_ready(
        boosted_linear_forward(x, w2_t, b2_2d, omega=omega, out_features=out2))
    assert jnp.allclose(y2, (x * omega) @ w2.T, atol=1e-3, rtol=1e-3)

    print("KERNEL_OK")
</pallas_src>

<mosaic_0001>
module attributes {stable_mosaic.version = 11 : i64} {
  func.func @_boosted_linear_kernel(%arg0: i32, %arg1: i32, %arg2: memref<16x32xf32, #tpu.memory_space<vmem>>, %arg3: memref<32x128xf32, #tpu.memory_space<vmem>>, %arg4: memref<1x128xf32, #tpu.memory_space<vmem>>, %arg5: memref<16x128xf32, #tpu.memory_space<vmem>>) attributes {dimension_semantics = [#tpu.dimension_semantics<parallel>, #tpu.dimension_semantics<parallel>], iteration_bounds = array<i64: 1, 1>, scalar_prefetch = 0 : i64, scratch_operands = 0 : i64, tpu.core_type = #tpu.core_type<tc>, window_params = [{transform_indices = @transform_0, window_bounds = array<i64: 16, 32>}, {transform_indices = @transform_1, window_bounds = array<i64: 32, 128>}, {transform_indices = @transform_2, window_bounds = array<i64: 1, 128>}, {transform_indices = @transform_3, window_bounds = array<i64: 16, 128>}]} {
    %c0 = arith.constant 0 : index
    %c0_0 = arith.constant 0 : index
    %0 = vector.load %arg2[%c0, %c0_0] : memref<16x32xf32, #tpu.memory_space<vmem>>, vector<16x32xf32>
    %cst = arith.constant 3.000000e+01 : f32
    %1 = vector.broadcast %cst : f32 to vector<16x32xf32>
    %2 = arith.mulf %0, %1 : vector<16x32xf32>
    %c0_1 = arith.constant 0 : index
    %c0_2 = arith.constant 0 : index
    %3 = vector.load %arg3[%c0_1, %c0_2] : memref<32x128xf32, #tpu.memory_space<vmem>>, vector<32x128xf32>
    %cst_3 = arith.constant dense<0.000000e+00> : vector<16x128xf32>
    %4 = tpu.matmul %2, %3, %cst_3 {dimension_numbers = #tpu.dot_dimension_numbers<[1], [0], [0], [1], [0, 0, 1, 1], [], []>} : vector<16x32xf32>, vector<32x128xf32>, vector<16x128xf32> -> vector<16x128xf32>
    %c0_4 = arith.constant 0 : index
    %c0_5 = arith.constant 0 : index
    %5 = vector.load %arg4[%c0_4, %c0_5] : memref<1x128xf32, #tpu.memory_space<vmem>>, vector<1x128xf32>
    %6 = vector.broadcast %5 : vector<1x128xf32> to vector<16x128xf32>
    %7 = arith.addf %4, %6 : vector<16x128xf32>
    %c0_6 = arith.constant 0 : index
    %c0_7 = arith.constant 0 : index
    %8 = vector.load %arg5[%c0_6, %c0_7] : memref<16x128xf32, #tpu.memory_space<vmem>>, vector<16x128xf32>
    tpu.vector_store %arg5[%c0_6, %c0_7], %7 {strides = array<i32>} : memref<16x128xf32, #tpu.memory_space<vmem>>, vector<16x128xf32>,
    return
  }
  func.func @transform_0(%arg0: i32, %arg1: i32) -> (i32, i32) {
    %c0_i32 = arith.constant 0 : i32
    %c0_i32_0 = arith.constant 0 : i32
    return %arg0, %c0_i32 : i32, i32
  }
  func.func @transform_1(%arg0: i32, %arg1: i32) -> (i32, i32) {
    %c0_i32 = arith.constant 0 : i32
    %c0_i32_0 = arith.constant 0 : i32
    return %c0_i32, %arg1 : i32, i32
  }
  func.func @transform_2(%arg0: i32, %arg1: i32) -> (i32, i32) {
    %c0_i32 = arith.constant 0 : i32
    %c0_i32_0 = arith.constant 0 : i32
    return %c0_i32, %arg1 : i32, i32
  }
  func.func @transform_3(%arg0: i32, %arg1: i32) -> (i32, i32) {
    %c0_i32 = arith.constant 0 : i32
    return %arg0, %arg1 : i32, i32
  }
}

</mosaic_0001>

<bundles_post_ra>
// kernel: boosted_linear_forward.1
= control target key start
LH: loop header
LB: loop body
LE: loop exit
PB: predicated region body
PF: predicated region fallthrough
CT: control target
= control target key end

     0   :  { %8 = vsyncpa [#allocation3], 0  ;;  %s284_s0 = inlined_call_operand.hbm [shape: f32[16,32], index: 0, kind: input, shape index: {}]   ;;  %s285_s1 = inlined_call_operand.hbm [shape: f32[32,128], index: 1, kind: input, shape index: {}]   ;;  %s286_s2 = inlined_call_operand.vmem [shape: f32[1,128], index: 2, kind: input, shape index: {}]   ;;  %s287_s3 = inlined_call_operand.vmem [shape: f32[16,128], index: 3, kind: output, shape index: {}]  }
   0x1   :  { %9 = vsyncpa [#allocation5], 0  ;;  %s227_s12 = smov [#allocation2]   ;;  %s179_s16 = scalar_lea.hbm %s284_s0, 256 }
   0x2   :  { %s15_s13 = sshll.u32 %s227_s12, 4  ;;  %p180_p0 = scmp.ne.s32.totalorder %s284_s0, %s179_s16  ;;  %s16_s13 = int_to_ptr.vmem [resolvable:$true] %s15_s13 }
   0x3   :  { %p183_p1 = scmp.lt.u32.totalorder %s179_s16, %s284_s0 }
   0x5   :  { %p185_p2 = pnand %p183_p1, %p180_p0 }
   0x7   :  { %188 = shalt.err (!%p185_p2)
}
   0x8   :  { %s189_s21 = scalar_lea.vmem %s16_s13, 256  ;;  %p194_p4 = scmp.lt.s32.totalorder %s16_s13, %s16_s13 }
   0x9   :  { %p190_p3 = scmp.ne.s32.totalorder %s16_s13, %s189_s21  ;;  %p195_p5 = scmp.lt.s32.totalorder %s189_s21, %s189_s21 }
   0xb   :  { %p196_p6 = por %p195_p5, %p194_p4 }
   0xd   :  { %p197_p7 = pnand %p196_p6, %p190_p3 }
   0xf   :  { %200 = shalt.err (!%p197_p7)
}
  0x10   :  { %s228_s22 = smov 128   ;;  %s229_s23 = smov 8  }
  0x11   :  { %21 = dma.hbm_to_vmem [thread:$0]  %s284_s0, 256, %s16_s13, [#allocation3], %s228_s22, %s228_s22, %s229_s23  }
  0x12   :  { %s230_s26 = smov [#allocation4]   ;;  %s201_s30 = scalar_lea.hbm %s285_s1, 512 }
  0x13   :  { %s27_s27 = sshll.u32 %s230_s26, 4  ;;  %p202_p8 = scmp.ne.s32.totalorder %s285_s1, %s201_s30  ;;  %s28_s27 = int_to_ptr.vmem [resolvable:$true] %s27_s27 }
  0x14   :  { %p205_p9 = scmp.lt.u32.totalorder %s201_s30, %s285_s1 }
  0x16   :  { %p207_p10 = pnand %p205_p9, %p202_p8 }
  0x18   :  { %210 = shalt.err (!%p207_p10)
}
  0x19   :  { %s211_s8 = scalar_lea.vmem %s28_s27, 512  ;;  %p216_p12 = scmp.lt.s32.totalorder %s28_s27, %s28_s27 }
  0x1a   :  { %p212_p11 = scmp.ne.s32.totalorder %s28_s27, %s211_s8  ;;  %p217_p13 = scmp.lt.s32.totalorder %s211_s8, %s211_s8 }
  0x1c   :  { %p218_p0 = por %p217_p13, %p216_p12 }
  0x1e   :  { %p219_p1 = pnand %p218_p0, %p212_p11 }
  0x20   :  { %222 = shalt.err (!%p219_p1)
}
  0x21   :  { %33 = dma.hbm_to_vmem [thread:$0]  %s285_s1, 512, %s28_s27, [#allocation5], %s228_s22, %s228_s22, %s229_s23  }
  0x22   :  { %223 = dma.done.wait [#allocation3], 256  }
  0x23   :  { %224 = vsyncadd [#allocation3], 4294967040 }
  0x24   :  { %225 = dma.done.wait [#allocation5], 512  }
  0x25   :  { %226 = vsyncadd [#allocation5], 4294966784  ;;  %v46_v0 = vld [vmem:[#allocation4] sm:$0xff]  ;;  %v47_v1 = vld [vmem:[#allocation4 + $0x8] sm:$0xff]  ;;  %vm57_vm0 = vcmask 261120  }
  0x26   :  { %v48_v2 = vld [vmem:[#allocation4 + $0x10] sm:$0xff]  ;;  %v167_v3 = vpack.c.bf16 %v47_v1, %v46_v0  ;;  %v49_v4 = vld [vmem:[#allocation4 + $0x18] sm:$0xff] }
  0x27   :  { %v42_v5 = vld [vmem:[#allocation2] sm:$0xff]  ;;  %v171_v6 = vpack.c.bf16 %v49_v4, %v48_v2  ;;  %v43_v8 = vld [vmem:[#allocation2 + $0x8] sm:$0xff] }
  0x28   :  { %v44_v7 = vmul.f32 30.0, %v42_v5  ;;  %168 = vmatprep.subr.bf16.mxu0 %v167_v3  ;;  %v45_v9 = vmul.f32 30.0, %v43_v8  ;;  %v147_v10 = vld [vmem:[%s286_s2] ss:$0 sm:$0xff] }
  0x29   :  { %170 = vmatpush3.bf16.msra.mxu0 %v167_v3 }
  0x2a   :  { %164 = vmatprep.mubr.msk.f32.mxu0 %vm57_vm0, %v44_v7  ;;  %172 = vmatprep.subr.bf16.mxu0 %v171_v6 }
  0x2d   :  { %174 = vmatpush3.bf16.msra.mxu0 %v171_v6 }
  0x30   :  { %165 = vmatmul.mubr.msk.f32.vlgmr.msra.gmra.mrb[0].mxu0 %vm57_vm0, %v45_v9 }
 0x103   :  { %v166_v11 = vpop.f32.mrb[0].mxu0 }
 0x104   :  { %v136_v12 = vadd.f32 %v166_v11, %v147_v10  ;;  %v130_v13 = vpop.f32.mrb[1].mxu0 }
 0x105   :  { %v131_v14 = vadd.f32 %v147_v10, %v130_v13 }
 0x106   :  { %140 = vst [vmem:[%s287_s3 + $0x8] sm:$0xff] %v136_v12 }
 0x107   :  { %139 = vst [vmem:[%s287_s3] sm:$0xff] %v131_v14 }
 0x108   :  { %145 = vsyncpa [#allocation3], 1 }
 0x109   :  { %146 = vsyncpa [#allocation5], 1 }

</bundles_post_ra>
